<compile_context>
chip_gen: v7x
topology: tpu7x:2x2x1
jax: 0.10.0
libtpu: 0.0.40
codegen_flags: <defaults>
</compile_context>

<pallas_src>
import functools
import math

import jax
import jax.numpy as jnp
from jax.experimental import pallas as pl
from jax.experimental.pallas import tpu as pltpu

_TARGET_BLOCK_BYTES = 4 << 20    # ~4 MiB per x block (per buffer)
_VMEM_LIMIT_BYTES = 40 << 20     # safe on v5e/v6e (128 MiB phys) and v7x (64 MiB)


# --------------------------------------------------------------------------- #
# Kernels
# --------------------------------------------------------------------------- #
def _pe_add_kernel(x_ref, pe_ref, o_ref):
    """Inference: out = x + pe (dropout is identity in eval mode).

    x_ref/o_ref: (tile_s, B*D); pe_ref: (tile_s, D).  The batch broadcast is
    done with static lane-slices (zero-cost ref views, no concat/reshape).
    """
    d = pe_ref.shape[-1]
    b = x_ref.shape[-1] // d
    pe = pe_ref[...]
    for i in range(b):                    # static, unrolled over batch
        sl = slice(i * d, (i + 1) * d)
        o_ref[:, sl] = x_ref[:, sl] + pe


def _pe_add_dropout_kernel(seed_ref, x_ref, pe_ref, o_ref, *,
                           keep_threshold, inv_keep_prob):
    """Training: out = inverted-dropout(x + pe), in-kernel hardware PRNG."""
    d = pe_ref.shape[-1]
    b = x_ref.shape[-1] // d
    pe = pe_ref[...]
    for i in range(b):                    # x + pe, written into the out block
        sl = slice(i * d, (i + 1) * d)
        o_ref[:, sl] = x_ref[:, sl] + pe
    y = o_ref[...]                        # VMEM read-back of the just-written block
    # Distinct PRNG stream per grid tile (mask depends on tiling for a seed).
    pltpu.prng_seed(seed_ref[0] + pl.program_id(0) * 1000003)
    bits = pltpu.bitcast(pltpu.prng_random_bits(y.shape), jnp.uint32)
    # Integer-domain Bernoulli(1 - p): keep iff bits >= round(p * 2^32).
    keep = bits >= jnp.uint32(keep_threshold)
    o_ref[...] = jnp.where(keep, y * jnp.asarray(inv_keep_prob, y.dtype),
                           jnp.zeros_like(y))


# --------------------------------------------------------------------------- #
# pe table (identical to the PyTorch __init__; setup, not forward)
# --------------------------------------------------------------------------- #
def make_positional_encoding_table(d_model, max_len=5000, dtype=jnp.float32):
    position = jnp.arange(max_len, dtype=jnp.float32)[:, None]
    div_term = jnp.exp(
        jnp.arange(0, d_model, 2, dtype=jnp.float32) * (-math.log(10000.0) / d_model))
    pe = jnp.zeros((max_len, 1, d_model), jnp.float32)
    pe = pe.at[:, 0, 0::2].set(jnp.sin(position * div_term))
    pe = pe.at[:, 0, 1::2].set(jnp.cos(position * div_term))
    return pe.astype(dtype)


# --------------------------------------------------------------------------- #
# Wrapper
# --------------------------------------------------------------------------- #
def _choose_tile_s(S, row_bytes):
    """Largest seq tile (multiple of 8, or full S) with ~_TARGET_BLOCK_BYTES
    per x block; keeps >=2 grid blocks when S is big enough (v7x megacore)."""
    tile = max(8, (_TARGET_BLOCK_BYTES // max(row_bytes, 1)) // 8 * 8)
    if tile >= S:
        if S > 16:
            half = (S + 1) // 2
            tile = -(-half // 8) * 8       # round up to a multiple of 8
            if tile >= S:
                tile = S
        else:
            tile = S                        # full-extent block (always legal)
    return tile


def _pe_forward_impl(x, pe, seed, *, dropout_p, training, donate_x):
    S, B, D = x.shape
    dtype = x.dtype

    # Layout-free 2D views: x rows are seq positions, lanes are (batch, d_model).
    x2 = x.reshape(S, B * D)
    pe2 = pe[:S].reshape(S, D).astype(dtype)          # un-broadcast: S*D elems only

    row_bytes = B * D * jnp.dtype(dtype).itemsize
    tile_s = _choose_tile_s(S, row_bytes)
    grid = (pl.cdiv(S, tile_s),)
    out_shape = jax.ShapeDtypeStruct((S, B * D), dtype)
    cparams = pltpu.CompilerParams(
        dimension_semantics=("parallel",),
        vmem_limit_bytes=_VMEM_LIMIT_BYTES)

    p = float(dropout_p) if training else 0.0
    if p == 0.0:
        x_spec = pl.BlockSpec((tile_s, B * D), lambda i: (i, 0))
        pe_spec = pl.BlockSpec((tile_s, D), lambda i: (i, 0))
        out2 = pl.pallas_call(
            _pe_add_kernel,
            out_shape=out_shape,
            grid=grid,
            in_specs=[x_spec, pe_spec],
            out_specs=x_spec,
            input_output_aliases=({0: 0} if donate_x else {}),
            compiler_params=cparams,
        )(x2, pe2)
    else:
        keep_threshold = min(int(round(p * (1 << 32))), (1 << 32) - 1)
        kernel = functools.partial(_pe_add_dropout_kernel,
                                   keep_threshold=keep_threshold,
                                   inv_keep_prob=1.0 / (1.0 - p))
        out2 = pl.pallas_call(
            kernel,
            out_shape=out_shape,
            grid_spec=pltpu.PrefetchScalarGridSpec(
                num_scalar_prefetch=1,                 # seed lands in SMEM
                grid=grid,
                in_specs=[pl.BlockSpec((tile_s, B * D), lambda i, s: (i, 0)),
                          pl.BlockSpec((tile_s, D), lambda i, s: (i, 0))],
                out_specs=pl.BlockSpec((tile_s, B * D), lambda i, s: (i, 0)),
            ),
            input_output_aliases=({1: 0} if donate_x else {}),   # seed is arg 0
            compiler_params=cparams,
        )(jnp.asarray(seed, jnp.int32).reshape(1), x2, pe2)

    return out2.reshape(S, B, D)


@functools.partial(jax.jit, static_argnames=("dropout_p", "training"))
def positional_encoding_forward(x, pe, seed=0, *, dropout_p=0.1, training=False):
    """Pallas forward of PositionalEncoding.  x: (S, B, D); pe: (max_len, 1, D)."""
    return _pe_forward_impl(x, pe, seed, dropout_p=dropout_p, training=training,
                            donate_x=False)


@functools.partial(jax.jit, static_argnames=("dropout_p", "training"),
                   donate_argnums=(0,))
def positional_encoding_forward_donated(x, pe, seed=0, *, dropout_p=0.1,
                                        training=False):
    """Same forward, but x's HBM buffer is donated and aliased to the output."""
    return _pe_forward_impl(x, pe, seed, dropout_p=dropout_p, training=training,
                            donate_x=True)


# --------------------------------------------------------------------------- #
# Demo / self-test
# --------------------------------------------------------------------------- #
if __name__ == "__main__":
    # Small shapes consistent with the module: (seq=8, batch=2, d_model=32)
    S, B, D = 8, 2, 32
    key = jax.random.PRNGKey(0)
    x = jax.random.normal(key, (S, B, D), dtype=jnp.float32)
    pe = make_positional_encoding_table(D, max_len=5000)

    ref = x + pe[:S]

    # Eval-mode forward (dropout is identity) -- deterministic reference check.
    out = positional_encoding_forward(x, pe, dropout_p=0.1, training=False)
    out = jax.block_until_ready(out)
    assert out.shape == (S, B, D)
    assert jnp.allclose(out, ref, atol=1e-6, rtol=1e-6), "eval-mode mismatch"

    # Donated variant: x buffer is aliased to the output (no extra HBM alloc).
    x_copy = jnp.array(x)                      # fresh buffer safe to donate
    out_d = positional_encoding_forward_donated(x_copy, pe, dropout_p=0.1,
                                                training=False)
    out_d = jax.block_until_ready(out_d)
    assert jnp.allclose(out_d, ref, atol=1e-6, rtol=1e-6), "donated-path mismatch"

    # Training-mode dropout uses the TPU hardware PRNG inside the kernel; it
    # only lowers on a real TPU backend (no interpret rule for prng_seed).
    if jax.default_backend() == "tpu":
        out_tr = positional_encoding_forward(x, pe, 42, dropout_p=0.1,
                                             training=True)
        out_tr = jax.block_until_ready(out_tr)
        assert out_tr.shape == (S, B, D)
        # Every element is either dropped (exactly 0) or scaled by 1/(1-p).
        scaled = ref / (1.0 - 0.1)
        ok = jnp.isclose(out_tr, scaled, atol=1e-5) | (out_tr == 0.0)
        assert bool(jnp.all(ok)), "training-mode dropout mismatch"

    print("KERNEL_OK")
</pallas_src>

<mosaic_0001>
module attributes {stable_mosaic.version = 11 : i64} {
  func.func @_pe_add_kernel(%arg0: i32, %arg1: memref<8x64xf32, #tpu.memory_space<vmem>>, %arg2: memref<8x32xf32, #tpu.memory_space<vmem>>, %arg3: memref<8x64xf32, #tpu.memory_space<vmem>>) attributes {dimension_semantics = [#tpu.dimension_semantics<parallel>], iteration_bounds = array<i64: 1>, scalar_prefetch = 0 : i64, scratch_operands = 0 : i64, tpu.core_type = #tpu.core_type<tc>, window_params = [{transform_indices = @transform_0, window_bounds = array<i64: 8, 64>}, {transform_indices = @transform_1, window_bounds = array<i64: 8, 32>}, {transform_indices = @transform_2, window_bounds = array<i64: 8, 64>}]} {
    %c0 = arith.constant 0 : index
    %c0_0 = arith.constant 0 : index
    %0 = vector.load %arg2[%c0, %c0_0] : memref<8x32xf32, #tpu.memory_space<vmem>>, vector<8x32xf32>
    %c0_1 = arith.constant 0 : index
    %c0_2 = arith.constant 0 : index
    %1 = vector.load %arg1[%c0_1, %c0_2] : memref<8x64xf32, #tpu.memory_space<vmem>>, vector<8x32xf32>
    %2 = arith.addf %1, %0 : vector<8x32xf32>
    %c0_3 = arith.constant 0 : index
    %c0_4 = arith.constant 0 : index
    %3 = vector.load %arg3[%c0_3, %c0_4] : memref<8x64xf32, #tpu.memory_space<vmem>>, vector<8x32xf32>
    tpu.vector_store %arg3[%c0_3, %c0_4], %2 {strides = array<i32>} : memref<8x64xf32, #tpu.memory_space<vmem>>, vector<8x32xf32>,
    %c0_5 = arith.constant 0 : index
    %c32 = arith.constant 32 : index
    %4 = vector.load %arg1[%c0_5, %c32] : memref<8x64xf32, #tpu.memory_space<vmem>>, vector<8x32xf32>
    %5 = arith.addf %4, %0 : vector<8x32xf32>
    %c0_6 = arith.constant 0 : index
    %c32_7 = arith.constant 32 : index
    %6 = vector.load %arg3[%c0_6, %c32_7] : memref<8x64xf32, #tpu.memory_space<vmem>>, vector<8x32xf32>
    tpu.vector_store %arg3[%c0_6, %c32_7], %5 {strides = array<i32>} : memref<8x64xf32, #tpu.memory_space<vmem>>, vector<8x32xf32>,
    return
  }
  func.func @transform_0(%arg0: i32) -> (i32, i32) {
    %c0_i32 = arith.constant 0 : i32
    %c0_i32_0 = arith.constant 0 : i32
    return %arg0, %c0_i32 : i32, i32
  }
  func.func @transform_1(%arg0: i32) -> (i32, i32) {
    %c0_i32 = arith.constant 0 : i32
    %c0_i32_0 = arith.constant 0 : i32
    return %arg0, %c0_i32 : i32, i32
  }
  func.func @transform_2(%arg0: i32) -> (i32, i32) {
    %c0_i32 = arith.constant 0 : i32
    %c0_i32_0 = arith.constant 0 : i32
    return %arg0, %c0_i32 : i32, i32
  }
}

</mosaic_0001>

<bundles_post_ra>
// kernel: positional_encoding_forward.1
= control target key start
LH: loop header
LB: loop body
LE: loop exit
PB: predicated region body
PF: predicated region fallthrough
CT: control target
= control target key end

     0   :  { %vm14_vm0 = vcmask 261120   ;;  %s29_s13 = smov 32   ;;  %vm22_vm1 = vcmask 523520   ;;  %s57_s0 = inlined_call_operand.vmem [shape: f32[8,64], index: 0, kind: input, shape index: {}]   ;;  %s58_s1 = inlined_call_operand.vmem [shape: f32[8,32], index: 1, kind: input, shape index: {}]   ;;  %s59_s2 = inlined_call_operand.vmem [shape: f32[8,64], index: 2, kind: output, shape index: {}]  }
   0x1   :  { %v11_v0 = vld [vmem:[%s58_s1] sm:$0xff] }
   0x2   :  { %v12_v1 = vld [vmem:[%s57_s0] sm:$0xff]  ;;  %18 = vrot.lane.b32.xlu0 %v11_v0, %s29_s13 }
   0x3   :  { %v13_v2 = vadd.f32 %v12_v1, %v11_v0 }
   0x5   :  { %15 = vst.msk [vmem:[%s59_s2] sm:$0xff] %vm14_vm0, %v13_v2 }
  0x74   :  { %v19_v3 = vpop.permute.xlu0 %18 }
  0x75   :  { %v21_v4 = vadd.f32 %v19_v3, %v12_v1 }
  0x77   :  { %23 = vst.msk [vmem:[%s59_s2] sm:$0xff] %vm22_vm1, %v21_v4 }

</bundles_post_ra>
